<compile_context>
chip_gen: v6e
topology: v6e:2x2x1
jax: 0.10.0
libtpu: 0.0.40
codegen_flags: <defaults>
</compile_context>

<pallas_src>
import functools

import jax
import jax.numpy as jnp
from jax.experimental import pallas as pl
from jax.experimental.pallas import tpu as pltpu


def _round_up(x, m):
    return (x + m - 1) // m * m


def _conv_module_kernel(x_ref, keep_ref, w1_ref, w2_ref, vecs_ref, dw_ref, o_ref,
                        *, kernel_size, c_real, fast_sigmoid):
    """One grid step: a (R, Cp) slab, R = Bblk * Tp rows laid out batch-major."""
    R, Cp = x_ref.shape
    K = kernel_size
    PAD = (K - 1) // 2

    def sigmoid(v):
        if fast_sigmoid:          # bf16 transcendental -> EUP at 2x rate on v6e/v7x
            return jax.nn.sigmoid(v.astype(jnp.bfloat16)).astype(jnp.float32)
        return jax.nn.sigmoid(v)

    # ---- pointwise_conv1: one wide (Cp, 2Cp) matmul; a/gate split at a lane boundary ----
    y = jnp.dot(x_ref[...], w1_ref[...], preferred_element_type=jnp.float32)
    a = y[:, :Cp] + vecs_ref[0:1, :]
    g = y[:, Cp:] + vecs_ref[1:2, :]
    glu = a * sigmoid(g)

    # ---- key-padding mask (masked_fill 0.0); also zeroes padded/guard rows ----
    glu = glu * keep_ref[...]                                   # (R, Cp) * (R, 1)

    # ---- depthwise conv (groups=channels, 'same' zero padding) ----
    # Each tap is a sublane roll of the whole slab.  Every batch has >= PAD
    # trailing zero (guard) rows, so taps that cross a batch boundary or the slab
    # edge (roll wrap-around) only read zeros or land in discarded rows -- no
    # per-tap mask needed.
    acc = jnp.zeros((R, Cp), jnp.float32)
    for k in range(K):                                          # K is small & static
        d = k - PAD
        shifted = glu if d == 0 else pltpu.roll(glu, (-d) % R, 0)
        acc = acc + shifted * dw_ref[k:k + 1, :]
    acc = acc + vecs_ref[2:3, :]                                # depthwise bias

    # ---- LayerNorm over the real channels (two-pass, padded-lane corrected) ----
    # Padded lanes of acc are exactly zero, so the plain lane sum is the real-lane
    # sum; the centered sum-of-squares gets an exact (Cp - C) * mean^2 correction.
    inv_c = 1.0 / c_real
    mean = jnp.sum(acc, axis=-1, keepdims=True) * inv_c
    centered = acc - mean
    ssq = jnp.sum(centered * centered, axis=-1, keepdims=True)
    var = (ssq - float(Cp - c_real) * mean * mean) * inv_c
    normed = centered * jax.lax.rsqrt(var + 1e-5)
    normed = normed * vecs_ref[3:4, :] + vecs_ref[4:5, :]

    # ---- Swish ----
    sw = normed * sigmoid(normed)

    # ---- pointwise_conv2 ----
    out = jnp.dot(sw.astype(w2_ref.dtype), w2_ref[...],
                  preferred_element_type=jnp.float32) + vecs_ref[5:6, :]
    o_ref[...] = out.astype(o_ref.dtype)


def _vmem_limit_bytes():
    """Generation-aware scoped-VMEM limit (v5e/v6e: 128 MiB physical, v7x: 64 MiB)."""
    cap = 64 * 1024 * 1024                      # conservative fallback (v7x per-TC)
    try:
        cap = int(pltpu.get_tpu_info().vmem_capacity_bytes)
    except Exception:
        pass
    return min((cap * 3) // 4, 96 * 1024 * 1024)


def _pick_bblk(batch, t_pad, c_pad, x_itemsize, w_itemsize, vmem_budget):
    """Largest batch tile whose estimated per-step VMEM footprint fits the budget."""
    # grid-invariant operands (w1f: Cp x 2Cp, w2: Cp x Cp, vecs, dw), double-buffered
    fixed = 3 * c_pad * c_pad * w_itemsize * 2 + (6 + 16) * c_pad * 4 * 2
    # per-row bytes: x/out blocks (double-buffered), keep column, live f32 temporaries
    per_row = c_pad * (x_itemsize * 2 + 4 * 2) + 128 * 4 * 2 + c_pad * 4 * 8
    avail = max(vmem_budget - fixed, per_row * t_pad)
    return int(max(1, min(batch, avail // (per_row * t_pad))))


def convolution_module_forward(x_tbc, params, src_key_padding_mask=None,
                               matmul_dtype=jnp.bfloat16):
    """x_tbc: (T, B, C) float32.  src_key_padding_mask: optional (B, T) bool
    (True = padded key).  Returns (T, B, C), matching ConvolutionModule.forward."""
    T, B, C = x_tbc.shape
    K = params["dw_weight"].shape[-1]
    PAD = (K - 1) // 2

    Cp = _round_up(C, 128)                      # lane-dense channels
    Tp = _round_up(T + PAD, 8)                  # sublane-aligned + >= PAD guard rows

    itemsize = jnp.dtype(matmul_dtype).itemsize
    vmem_limit = _vmem_limit_bytes()
    bblk_max = _pick_bblk(B, Tp, Cp, itemsize, itemsize, (vmem_limit * 3) // 5)

    nblk = -(-B // bblk_max)                    # number of grid steps (ceil)
    if nblk == 1 and B >= 2:
        nblk = 2                                # keep grid >= 2: both v7x TCs busy
    Bblk = -(-B // nblk)                        # (nearly) divides B -> minimal padding
    Bp = nblk * Bblk

    # ---- glue: (T, B, C) -> (Bp*Tp, Cp), channels-last, batch-major rows ----
    x_btc = jnp.transpose(x_tbc, (1, 0, 2)).astype(matmul_dtype)
    x_btc = jnp.pad(x_btc, ((0, Bp - B), (0, Tp - T), (0, Cp - C)))
    x2d = x_btc.reshape(Bp * Tp, Cp)

    # keep = 1 where the GLU output is kept; 0 at masked keys and padded/guard rows.
    if src_key_padding_mask is None:
        keep = jnp.ones((B, T), jnp.float32)
    else:
        keep = 1.0 - src_key_padding_mask.astype(jnp.float32)
    keep = jnp.pad(keep, ((0, Bp - B), (0, Tp - T)))
    keep2d = keep.reshape(Bp * Tp, 1)

    # ---- re-pack PyTorch-shaped weights (lane-dense, channel-padded) ----
    pad_mat = lambda m: jnp.pad(m, ((0, Cp - C), (0, Cp - C)))
    pad_vec = lambda v: jnp.pad(v, (0, Cp - C))

    w1 = params["pw1_weight"][:, :, 0]                          # (2C, C)
    w1f = jnp.concatenate([pad_mat(w1[:C].T), pad_mat(w1[C:].T)],
                          axis=1).astype(matmul_dtype)          # (Cp, 2Cp) = a | gate
    w2 = pad_mat(params["pw2_weight"][:, :, 0].T).astype(matmul_dtype)   # (Cp, Cp)

    vecs = jnp.stack([pad_vec(params["pw1_bias"][:C]),
                      pad_vec(params["pw1_bias"][C:]),
                      pad_vec(params["dw_bias"]),
                      pad_vec(params["ln_weight"]),
                      pad_vec(params["ln_bias"]),
                      pad_vec(params["pw2_bias"])]).astype(jnp.float32)   # (6, Cp)

    dw = jnp.pad(params["dw_weight"][:, 0, :].T,
                 ((0, 0), (0, Cp - C))).astype(jnp.float32)               # (K, Cp)

    rows_blk = Bblk * Tp
    fast_sigmoid = jnp.dtype(matmul_dtype) == jnp.dtype(jnp.bfloat16)

    kernel = functools.partial(_conv_module_kernel, kernel_size=K,
                               c_real=C, fast_sigmoid=fast_sigmoid)

    out2d = pl.pallas_call(
        kernel,
        out_shape=jax.ShapeDtypeStruct((Bp * Tp, Cp), x_tbc.dtype),
        grid=(nblk,),
        in_specs=[
            pl.BlockSpec((rows_blk, Cp), lambda i: (i, 0)),     # x slab (matmul dtype)
            pl.BlockSpec((rows_blk, 1), lambda i: (i, 0)),      # keep mask
            pl.BlockSpec((Cp, 2 * Cp), lambda i: (0, 0)),       # fused pw1 weight
            pl.BlockSpec((Cp, Cp), lambda i: (0, 0)),           # pw2 weight
            pl.BlockSpec((6, Cp), lambda i: (0, 0)),            # biases / LN params
            pl.BlockSpec((K, Cp), lambda i: (0, 0)),            # depthwise taps
        ],
        out_specs=pl.BlockSpec((rows_blk, Cp), lambda i: (i, 0)),
        compiler_params=pltpu.CompilerParams(
            dimension_semantics=("parallel",),                  # independent slabs
            vmem_limit_bytes=int(vmem_limit)),
    )(x2d, keep2d, w1f, w2, vecs, dw)

    out = out2d.reshape(Bp, Tp, Cp)[:B, :T, :C]
    return jnp.transpose(out, (1, 0, 2))                        # (T, B, C)


def reference_forward(x_tbc, params, src_key_padding_mask=None):
    """Pure-JAX reference mirroring the PyTorch module."""
    T, B, C = x_tbc.shape
    K = params["dw_weight"].shape[-1]
    PAD = (K - 1) // 2
    x = jnp.transpose(x_tbc, (1, 2, 0))                        # (B, C, T)
    w1 = params["pw1_weight"][:, :, 0]                         # (2C, C)
    y = jnp.einsum("oc,bct->bot", w1, x) + params["pw1_bias"][None, :, None]
    a, g = y[:, :C, :], y[:, C:, :]
    glu = a * jax.nn.sigmoid(g)
    if src_key_padding_mask is not None:
        glu = jnp.where(src_key_padding_mask[:, None, :], 0.0, glu)
    gp = jnp.pad(glu, ((0, 0), (0, 0), (PAD, PAD)))
    dw = params["dw_weight"][:, 0, :]                          # (C, K)
    dconv = sum(gp[:, :, k:k + T] * dw[:, k][None, :, None] for k in range(K))
    dconv = dconv + params["dw_bias"][None, :, None]
    h = jnp.transpose(dconv, (0, 2, 1))                        # (B, T, C)
    mean = jnp.mean(h, axis=-1, keepdims=True)
    var = jnp.mean((h - mean) ** 2, axis=-1, keepdims=True)
    h = (h - mean) / jnp.sqrt(var + 1e-5)
    h = h * params["ln_weight"] + params["ln_bias"]
    h = jnp.transpose(h, (0, 2, 1))                            # (B, C, T)
    h = h * jax.nn.sigmoid(h)
    w2 = params["pw2_weight"][:, :, 0]
    out = jnp.einsum("oc,bct->bot", w2, h) + params["pw2_bias"][None, :, None]
    return jnp.transpose(out, (2, 0, 1))                       # (T, B, C)


def init_params(key, channels, kernel_size):
    ks = jax.random.split(key, 6)
    s = 0.1
    return {
        "pw1_weight": s * jax.random.normal(ks[0], (2 * channels, channels, 1), jnp.float32),
        "pw1_bias":   s * jax.random.normal(ks[1], (2 * channels,), jnp.float32),
        "dw_weight":  s * jax.random.normal(ks[2], (channels, 1, kernel_size), jnp.float32),
        "dw_bias":    s * jax.random.normal(ks[3], (channels,), jnp.float32),
        "ln_weight":  jnp.ones((channels,), jnp.float32),
        "ln_bias":    jnp.zeros((channels,), jnp.float32),
        "pw2_weight": s * jax.random.normal(ks[4], (channels, channels, 1), jnp.float32),
        "pw2_bias":   s * jax.random.normal(ks[5], (channels,), jnp.float32),
    }


if __name__ == "__main__":
    T, B, C, K = 16, 2, 64, 5
    key = jax.random.PRNGKey(0)
    kx, kp = jax.random.split(key)
    x = jax.random.normal(kx, (T, B, C), jnp.float32)
    params = init_params(kp, C, K)

    # src_key_padding_mask: True = padded position (batch 1 has 3 padded frames)
    mask = jnp.zeros((B, T), jnp.bool_).at[1, T - 3:].set(True)

    ref = reference_forward(x, params, mask)

    # f32 matmul path: tight tolerance vs. the f32 reference (exactness check).
    out_f32 = jax.block_until_ready(
        convolution_module_forward(x, params, mask, matmul_dtype=jnp.float32))
    assert out_f32.shape == (T, B, C)
    assert jnp.allclose(out_f32, ref, atol=1e-4, rtol=1e-4), "f32 mismatch vs reference"

    # Default bf16-matmul / f32-accumulate path: looser tolerance.
    out = jax.block_until_ready(convolution_module_forward(x, params, mask))
    assert out.shape == (T, B, C)
    assert jnp.allclose(out, ref, atol=1e-1, rtol=1e-1), "bf16 mismatch vs reference"

    # no-mask path (f32 for a tight check of the keep-mask construction branch).
    ref_nm = reference_forward(x, params, None)
    out_nm = jax.block_until_ready(
        convolution_module_forward(x, params, None, matmul_dtype=jnp.float32))
    assert jnp.allclose(out_nm, ref_nm, atol=1e-4, rtol=1e-4), "no-mask mismatch"

    print("KERNEL_OK")
</pallas_src>

<mosaic_0001>
module attributes {stable_mosaic.version = 11 : i64} {
  func.func @_conv_module_kernel(%arg0: i32, %arg1: memref<24x128xf32, #tpu.memory_space<vmem>>, %arg2: memref<24x1xf32, #tpu.memory_space<vmem>>, %arg3: memref<128x256xf32, #tpu.memory_space<vmem>>, %arg4: memref<128x128xf32, #tpu.memory_space<vmem>>, %arg5: memref<6x128xf32, #tpu.memory_space<vmem>>, %arg6: memref<5x128xf32, #tpu.memory_space<vmem>>, %arg7: memref<24x128xf32, #tpu.memory_space<vmem>>) attributes {dimension_semantics = [#tpu.dimension_semantics<parallel>], iteration_bounds = array<i64: 2>, scalar_prefetch = 0 : i64, scratch_operands = 0 : i64, tpu.core_type = #tpu.core_type<tc>, window_params = [{transform_indices = @transform_0, window_bounds = array<i64: 24, 128>}, {transform_indices = @transform_1, window_bounds = array<i64: 24, 1>}, {pipeline_mode = #tpu.pipeline_mode<synchronous>, transform_indices = @transform_2, window_bounds = array<i64: 128, 256>}, {pipeline_mode = #tpu.pipeline_mode<synchronous>, transform_indices = @transform_3, window_bounds = array<i64: 128, 128>}, {pipeline_mode = #tpu.pipeline_mode<synchronous>, transform_indices = @transform_4, window_bounds = array<i64: 6, 128>}, {pipeline_mode = #tpu.pipeline_mode<synchronous>, transform_indices = @transform_5, window_bounds = array<i64: 5, 128>}, {transform_indices = @transform_6, window_bounds = array<i64: 24, 128>}]} {
    %c0 = arith.constant 0 : index
    %c0_0 = arith.constant 0 : index
    %0 = vector.load %arg1[%c0, %c0_0] : memref<24x128xf32, #tpu.memory_space<vmem>>, vector<24x128xf32>
    %c0_1 = arith.constant 0 : index
    %c0_2 = arith.constant 0 : index
    %1 = vector.load %arg3[%c0_1, %c0_2] : memref<128x256xf32, #tpu.memory_space<vmem>>, vector<128x256xf32>
    %cst = arith.constant dense<0.000000e+00> : vector<24x256xf32>
    %2 = tpu.matmul %0, %1, %cst {dimension_numbers = #tpu.dot_dimension_numbers<[1], [0], [0], [1], [0, 0, 1, 1], [], []>} : vector<24x128xf32>, vector<128x256xf32>, vector<24x256xf32> -> vector<24x256xf32>
    %3 = vector.extract_strided_slice %2 {offsets = [0, 0], sizes = [24, 128], strides = [1, 1]} : vector<24x256xf32> to vector<24x128xf32>
    %c0_3 = arith.constant 0 : index
    %c0_4 = arith.constant 0 : index
    %4 = vector.load %arg5[%c0_3, %c0_4] : memref<6x128xf32, #tpu.memory_space<vmem>>, vector<1x128xf32>
    %5 = vector.broadcast %4 : vector<1x128xf32> to vector<24x128xf32>
    %6 = arith.addf %3, %5 : vector<24x128xf32>
    %7 = vector.extract_strided_slice %2 {offsets = [0, 128], sizes = [24, 128], strides = [1, 1]} : vector<24x256xf32> to vector<24x128xf32>
    %c1 = arith.constant 1 : index
    %c0_5 = arith.constant 0 : index
    %8 = vector.load %arg5[%c1, %c0_5] : memref<6x128xf32, #tpu.memory_space<vmem>>, vector<1x128xf32>
    %9 = vector.broadcast %8 : vector<1x128xf32> to vector<24x128xf32>
    %10 = arith.addf %7, %9 : vector<24x128xf32>
    %11 = arith.negf %10 : vector<24x128xf32>
    %12 = math.exp %11 : vector<24x128xf32>
    %cst_6 = arith.constant 1.000000e+00 : f32
    %13 = vector.broadcast %cst_6 : f32 to vector<24x128xf32>
    %14 = arith.addf %13, %12 : vector<24x128xf32>
    %15 = arith.divf %13, %14 : vector<24x128xf32>
    %16 = arith.mulf %6, %15 : vector<24x128xf32>
    %c0_7 = arith.constant 0 : index
    %c0_8 = arith.constant 0 : index
    %17 = vector.load %arg2[%c0_7, %c0_8] : memref<24x1xf32, #tpu.memory_space<vmem>>, vector<24x1xf32>
    %18 = vector.broadcast %17 : vector<24x1xf32> to vector<24x128xf32>
    %19 = arith.mulf %16, %18 : vector<24x128xf32>
    %cst_9 = arith.constant 0.000000e+00 : f32
    %20 = vector.broadcast %cst_9 : f32 to vector<24x128xf32>
    %c2_i32 = arith.constant 2 : i32
    %21 = tpu.dynamic_rotate %19 by %c2_i32 dim 0 : vector<24x128xf32>, i32 -> vector<24x128xf32>
    %c0_10 = arith.constant 0 : index
    %c0_11 = arith.constant 0 : index
    %22 = vector.load %arg6[%c0_10, %c0_11] : memref<5x128xf32, #tpu.memory_space<vmem>>, vector<1x128xf32>
    %23 = vector.broadcast %22 : vector<1x128xf32> to vector<24x128xf32>
    %24 = arith.mulf %21, %23 : vector<24x128xf32>
    %25 = arith.addf %20, %24 : vector<24x128xf32>
    %c1_i32 = arith.constant 1 : i32
    %26 = tpu.dynamic_rotate %19 by %c1_i32 dim 0 : vector<24x128xf32>, i32 -> vector<24x128xf32>
    %c1_12 = arith.constant 1 : index
    %c0_13 = arith.constant 0 : index
    %27 = vector.load %arg6[%c1_12, %c0_13] : memref<5x128xf32, #tpu.memory_space<vmem>>, vector<1x128xf32>
    %28 = vector.broadcast %27 : vector<1x128xf32> to vector<24x128xf32>
    %29 = arith.mulf %26, %28 : vector<24x128xf32>
    %30 = arith.addf %25, %29 : vector<24x128xf32>
    %c2 = arith.constant 2 : index
    %c0_14 = arith.constant 0 : index
    %31 = vector.load %arg6[%c2, %c0_14] : memref<5x128xf32, #tpu.memory_space<vmem>>, vector<1x128xf32>
    %32 = vector.broadcast %31 : vector<1x128xf32> to vector<24x128xf32>
    %33 = arith.mulf %19, %32 : vector<24x128xf32>
    %34 = arith.addf %30, %33 : vector<24x128xf32>
    %c23_i32 = arith.constant 23 : i32
    %35 = tpu.dynamic_rotate %19 by %c23_i32 dim 0 : vector<24x128xf32>, i32 -> vector<24x128xf32>
    %c3 = arith.constant 3 : index
    %c0_15 = arith.constant 0 : index
    %36 = vector.load %arg6[%c3, %c0_15] : memref<5x128xf32, #tpu.memory_space<vmem>>, vector<1x128xf32>
    %37 = vector.broadcast %36 : vector<1x128xf32> to vector<24x128xf32>
    %38 = arith.mulf %35, %37 : vector<24x128xf32>
    %39 = arith.addf %34, %38 : vector<24x128xf32>
    %c22_i32 = arith.constant 22 : i32
    %40 = tpu.dynamic_rotate %19 by %c22_i32 dim 0 : vector<24x128xf32>, i32 -> vector<24x128xf32>
    %c4 = arith.constant 4 : index
    %c0_16 = arith.constant 0 : index
    %41 = vector.load %arg6[%c4, %c0_16] : memref<5x128xf32, #tpu.memory_space<vmem>>, vector<1x128xf32>
    %42 = vector.broadcast %41 : vector<1x128xf32> to vector<24x128xf32>
    %43 = arith.mulf %40, %42 : vector<24x128xf32>
    %44 = arith.addf %39, %43 : vector<24x128xf32>
    %c2_17 = arith.constant 2 : index
    %c0_18 = arith.constant 0 : index
    %45 = vector.load %arg5[%c2_17, %c0_18] : memref<6x128xf32, #tpu.memory_space<vmem>>, vector<1x128xf32>
    %46 = vector.broadcast %45 : vector<1x128xf32> to vector<24x128xf32>
    %47 = arith.addf %44, %46 : vector<24x128xf32>
    %cst_19 = arith.constant dense<0.000000e+00> : vector<24xf32>
    %48 = vector.multi_reduction <add>, %47, %cst_19 [1] : vector<24x128xf32> to vector<24xf32>
    %49 = vector.shape_cast %48 : vector<24xf32> to vector<24x1xf32>
    %cst_20 = arith.constant 1.562500e-02 : f32
    %50 = vector.broadcast %cst_20 : f32 to vector<24x1xf32>
    %51 = arith.mulf %49, %50 : vector<24x1xf32>
    %52 = vector.broadcast %51 : vector<24x1xf32> to vector<24x128xf32>
    %53 = arith.subf %47, %52 : vector<24x128xf32>
    %54 = arith.mulf %53, %53 : vector<24x128xf32>
    %cst_21 = arith.constant dense<0.000000e+00> : vector<24xf32>
    %55 = vector.multi_reduction <add>, %54, %cst_21 [1] : vector<24x128xf32> to vector<24xf32>
    %56 = vector.shape_cast %55 : vector<24xf32> to vector<24x1xf32>
    %cst_22 = arith.constant 6.400000e+01 : f32
    %57 = vector.broadcast %cst_22 : f32 to vector<24x1xf32>
    %58 = arith.mulf %57, %51 : vector<24x1xf32>
    %59 = arith.mulf %58, %51 : vector<24x1xf32>
    %60 = arith.subf %56, %59 : vector<24x1xf32>
    %cst_23 = arith.constant 1.562500e-02 : f32
    %61 = vector.broadcast %cst_23 : f32 to vector<24x1xf32>
    %62 = arith.mulf %60, %61 : vector<24x1xf32>
    %cst_24 = arith.constant 9.99999974E-6 : f32
    %63 = vector.broadcast %cst_24 : f32 to vector<24x1xf32>
    %64 = arith.addf %62, %63 : vector<24x1xf32>
    %65 = math.rsqrt %64 : vector<24x1xf32>
    %66 = vector.broadcast %65 : vector<24x1xf32> to vector<24x128xf32>
    %67 = arith.mulf %53, %66 : vector<24x128xf32>
    %c3_25 = arith.constant 3 : index
    %c0_26 = arith.constant 0 : index
    %68 = vector.load %arg5[%c3_25, %c0_26] : memref<6x128xf32, #tpu.memory_space<vmem>>, vector<1x128xf32>
    %69 = vector.broadcast %68 : vector<1x128xf32> to vector<24x128xf32>
    %70 = arith.mulf %67, %69 : vector<24x128xf32>
    %c4_27 = arith.constant 4 : index
    %c0_28 = arith.constant 0 : index
    %71 = vector.load %arg5[%c4_27, %c0_28] : memref<6x128xf32, #tpu.memory_space<vmem>>, vector<1x128xf32>
    %72 = vector.broadcast %71 : vector<1x128xf32> to vector<24x128xf32>
    %73 = arith.addf %70, %72 : vector<24x128xf32>
    %74 = arith.negf %73 : vector<24x128xf32>
    %75 = math.exp %74 : vector<24x128xf32>
    %cst_29 = arith.constant 1.000000e+00 : f32
    %76 = vector.broadcast %cst_29 : f32 to vector<24x128xf32>
    %77 = arith.addf %76, %75 : vector<24x128xf32>
    %78 = arith.divf %76, %77 : vector<24x128xf32>
    %79 = arith.mulf %73, %78 : vector<24x128xf32>
    %c0_30 = arith.constant 0 : index
    %c0_31 = arith.constant 0 : index
    %80 = vector.load %arg4[%c0_30, %c0_31] : memref<128x128xf32, #tpu.memory_space<vmem>>, vector<128x128xf32>
    %cst_32 = arith.constant dense<0.000000e+00> : vector<24x128xf32>
    %81 = tpu.matmul %79, %80, %cst_32 {dimension_numbers = #tpu.dot_dimension_numbers<[1], [0], [0], [1], [0, 0, 1, 1], [], []>} : vector<24x128xf32>, vector<128x128xf32>, vector<24x128xf32> -> vector<24x128xf32>
    %c5 = arith.constant 5 : index
    %c0_33 = arith.constant 0 : index
    %82 = vector.load %arg5[%c5, %c0_33] : memref<6x128xf32, #tpu.memory_space<vmem>>, vector<1x128xf32>
    %83 = vector.broadcast %82 : vector<1x128xf32> to vector<24x128xf32>
    %84 = arith.addf %81, %83 : vector<24x128xf32>
    %c0_34 = arith.constant 0 : index
    %c0_35 = arith.constant 0 : index
    %85 = vector.load %arg7[%c0_34, %c0_35] : memref<24x128xf32, #tpu.memory_space<vmem>>, vector<24x128xf32>
    tpu.vector_store %arg7[%c0_34, %c0_35], %84 {strides = array<i32>} : memref<24x128xf32, #tpu.memory_space<vmem>>, vector<24x128xf32>,
    return
  }
  func.func @transform_0(%arg0: i32) -> (i32, i32) {
    %c0_i32 = arith.constant 0 : i32
    %c0_i32_0 = arith.constant 0 : i32
    return %arg0, %c0_i32 : i32, i32
  }
  func.func @transform_1(%arg0: i32) -> (i32, i32) {
    %c0_i32 = arith.constant 0 : i32
    %c0_i32_0 = arith.constant 0 : i32
    return %arg0, %c0_i32 : i32, i32
  }
  func.func @transform_2(%arg0: i32) -> (i32, i32) {
    %c0_i32 = arith.constant 0 : i32
    %c0_i32_0 = arith.constant 0 : i32
    %c0_i32_1 = arith.constant 0 : i32
    return %c0_i32, %c0_i32_0 : i32, i32
  }
  func.func @transform_3(%arg0: i32) -> (i32, i32) {
    %c0_i32 = arith.constant 0 : i32
    %c0_i32_0 = arith.constant 0 : i32
    %c0_i32_1 = arith.constant 0 : i32
    return %c0_i32, %c0_i32_0 : i32, i32
  }
  func.func @transform_4(%arg0: i32) -> (i32, i32) {
    %c0_i32 = arith.constant 0 : i32
    %c0_i32_0 = arith.constant 0 : i32
    %c0_i32_1 = arith.constant 0 : i32
    return %c0_i32, %c0_i32_0 : i32, i32
  }
  func.func @transform_5(%arg0: i32) -> (i32, i32) {
    %c0_i32 = arith.constant 0 : i32
    %c0_i32_0 = arith.constant 0 : i32
    %c0_i32_1 = arith.constant 0 : i32
    return %c0_i32, %c0_i32_0 : i32, i32
  }
  func.func @transform_6(%arg0: i32) -> (i32, i32) {
    %c0_i32 = arith.constant 0 : i32
    %c0_i32_0 = arith.constant 0 : i32
    return %arg0, %c0_i32 : i32, i32
  }
}

</mosaic_0001>

<bundles_post_ra>
// kernel: tpu_custom_call.1
= control target key start
LH: loop header
LB: loop body
LE: loop exit
PB: predicated region body
PF: predicated region fallthrough
CT: control target
= control target key end

     0   :  { %11 = vsyncpa [#allocation3], 0  ;;  %s1541_s0 = inlined_call_operand.vmem [shape: f32[48,128], index: 0, kind: input, shape index: {}]   ;;  %s1542_s1 = inlined_call_operand.vmem [shape: f32[48,1], index: 1, kind: input, shape index: {}]   ;;  %s1543_s2 = inlined_call_operand.hbm [shape: f32[128,256], index: 2, kind: input, shape index: {}]   ;;  %s1544_s3 = inlined_call_operand.hbm [shape: f32[128,128], index: 3, kind: input, shape index: {}]   ;;  %s1545_s4 = inlined_call_operand.vmem [shape: f32[6,128], index: 4, kind: input, shape index: {}]   ;;  %s1546_s5 = inlined_call_operand.hbm [shape: f32[5,128], index: 5, kind: input, shape index: {}]   ;;  %s1547_s6 = inlined_call_operand.hbm [shape: f32[48,128], index: 6, kind: output, shape index: {}]  }
   0x1   :  { %12 = vsyncpa [#allocation6], 0 }
   0x2   :  { %13 = vsyncpa [#allocation4], 0 }
   0x3   :  { %15 = vsyncpa [#allocation4 + $0x1], 0  ;;  %s1289_s21 = smov 0   ;;  %s1291_s22 = smov 0  }
   0x4   :  { %s1293_s23 = smov 0   ;;  %s1295_s24 = smov 0  }
   0x5 LB: > { %s1310_s25 = sadd.s32 4294967295, %s1239_s24   ;;  %s888_s26 = sadd.s32 4294967294, %s1239_s24   ;;  %s1239_s24 = sphi %s1295_s24, %s1561_s24   ;;  %s1235_s23 = sphi %s1293_s23, %s1560_s23   ;;  %s1231_s22 = sphi %s1291_s22, %s1559_s22   ;;  %s1227_s21 = sphi %s1289_s21, %s1558_s21  }
   0x6   : > { %s1314_s27 = sadd.s32 1, %s1239_s24   ;;  %s164_s28 = sadd.s32 1, %s1235_s23 }
   0x7   : > { %s161_s29 = ssub.s32 %s1239_s24, %s1314_s27  ;;  %p174_p0 = scmp.ne.s32.totalorder %s1235_s23, %s1231_s22 }
   0x8   : > { %p162_p1 = scmp.eq.s32.totalorder %s161_s29, 0  ;;  %p175_p2 = scmp.eq.s32.totalorder %s1310_s25, 1 }
   0x9   : > { %p180_p3 = scmp.ne.s32.totalorder %s1231_s22, %s1227_s21  ;;  %p181_p4 = scmp.eq.s32.totalorder %s888_s26, 1 }
   0xa   : > { %s1325_s30 = scalar_select %p162_p1, %s1235_s23, %s164_s28  }
   0xb   : > { %p1327_p5 = por %p175_p2, %p174_p0  ;;  %p1331_p6 = por %p181_p4, %p180_p3 }
   0xc   : > { %p889_p7 = scmp.ge.s32.totalorder %s1239_s24, 1  ;;  %p188_p8 = scmp.lt.s32.totalorder %s1239_s24, 3 }
   0xd   : > { %s1550_s8 = scalar_select %p1331_p6, 1, 0 }
   0xe   : > { %p1548_p9 = scmp.eq.s32.totalorder %s1310_s25, 0  ;;  %p1338_p10 = pnand %p889_p7, %p188_p8 }
   0xf   : > { %s1241_s10 = smov [#allocation5]   ;;  %s1242_s13 = smov [#allocation2]  }
  0x10   : > { %s213_s11 = sshll.u32 %s1241_s10, 4  ;;  %p996_p11 = pneg %p1338_p10  ;;  %s214_s11 = int_to_ptr.vmem [resolvable:$true] %s213_s11 }
  0x11   : > { %s200_s14 = sshll.u32 %s1242_s13, 4  ;;  %s1104_s15 = scalar_lea.vmem %s214_s11, 2048  ;;  %s201_s14 = int_to_ptr.vmem [resolvable:$true] %s200_s14 }
  0x12   : > { %p1346_p12 = pnand %p1548_p9, %p996_p11  ;;  %p1105_p0 = scmp.ne.s32.totalorder %s214_s11, %s1104_s15 }
  0x13   : > { %p1112_p3 = scmp.lt.s32.totalorder %s214_s11, %s214_s11  ;;  %p1113_p4 = scmp.lt.s32.totalorder %s1104_s15, %s1104_s15 }
  0x14   : > { %p1095_p13 = pneg %p1346_p12 }
  0x15   : > { %p1114_p7 = por %p1113_p4, %p1112_p3 }
  0x16   : > { %p1107_p1 = pnand %p1105_p0, %p1095_p13 }
  0x18   : > { %p1108_p2 = pneg %p1107_p1 }
  0x1a   : > { %p1115_p8 = pnand %p1114_p7, %p1108_p2 }
  0x1c   : > { %1118 = shalt.err (!%p1115_p8)
}
  0x1d   : > { %s1243_s16 = smov 128   ;;  %s1244_s17 = smov 8  }
  0x1e   : > { %1002 = dma.hbm_to_vmem [thread:$0]  (!%p1346_p12), %s1544_s3, 2048, %s214_s11, [#allocation6], %s1243_s16, %s1243_s16, %s1244_s17  }
  0x1f   : > { %s1130_s20 = scalar_lea.vmem %s201_s14, 4096  ;;  %p1138_p9 = scmp.lt.s32.totalorder %s201_s14, %s201_s14 }
  0x20   : > { %p1131_p11 = scmp.ne.s32.totalorder %s201_s14, %s1130_s20  ;;  %p1139_p6 = scmp.lt.s32.totalorder %s1130_s20, %s1130_s20 }
  0x22   : > { %p1133_p0 = pnand %p1131_p11, %p1095_p13  ;;  %p1140_p3 = por %p1139_p6, %p1138_p9 }
  0x24   : > { %p1134_p1 = pneg %p1133_p0 }
  0x26   : > { %p1141_p2 = pnand %p1140_p3, %p1134_p1 }
  0x28   : > { %1144 = shalt.err (!%p1141_p2)
}
  0x29   : > { %s1245_s26 = smov 256   ;;  %s1246_s28 = smov 16  }
  0x2a   : > { %999 = dma.hbm_to_vmem [thread:$0]  (!%p1346_p12), %s1543_s2, 4096, %s201_s14, [#allocation3], %s1245_s26, %s1245_s26, %s1246_s28  }
  0x2b   : > { %s1247_s11 = smov [#allocation7]  }
  0x2c   : > { %s230_s13 = sshll.u32 %s1247_s11, 4  ;;  %s231_s13 = int_to_ptr.vmem [resolvable:$true] %s230_s13 }
  0x2d   : > { %s1156_s15 = scalar_lea.vmem %s231_s13, 128  ;;  %p1164_p9 = scmp.lt.s32.totalorder %s231_s13, %s231_s13 }
  0x2e   : > { %p1157_p4 = scmp.ne.s32.totalorder %s231_s13, %s1156_s15  ;;  %p1165_p8 = scmp.lt.s32.totalorder %s1156_s15, %s1156_s15 }
  0x30   : > { %p1159_p7 = pnand %p1157_p4, %p1095_p13  ;;  %p1166_p11 = por %p1165_p8, %p1164_p9 }
  0x32   : > { %p1160_p6 = pneg %p1159_p7 }
  0x34   : > { %p1167_p0 = pnand %p1166_p11, %p1160_p6 }
  0x36   : > { %1170 = shalt.err (!%p1167_p0)
}
  0x37   : > { %1005 = dma.hbm_to_vmem [thread:$0]  (!%p1346_p12), %s1546_s5, 128, %s231_s13, [#allocation6]  }
  0x38   : > { %261 = sbr.rel (%p1338_p10) target bundleno = 915 (0x393), region = 44  ;;  %p1553_p1 = scmp.eq.s32.totalorder (!%p1338_p10), %s1310_s25, 0 }
  0x3d   : > { %1214 = dma.done.wait (%p1553_p1), [#allocation3], 4096   ;;  %p1554_p13 = pmov %p1553_p1 }
  0x3e   : > { %p1555_p3 = pmov %p1553_p1 }
  0x3f   : > { %1216 = vsyncadd (%p1554_p13), [#allocation3], 4294963200 }
  0x40   : > { %1218 = dma.done.wait (%p1555_p3), [#allocation6], 2176   ;;  %p1556_p2 = pmov %p1553_p1 }
  0x41   : > { %v1248_v0 = vmov 0.0   ;;  %v1249_v1 = vmov 0   ;;  %s304_s9 = smul.u32 3, %s1310_s25  ;;  %v351_v2 = vld [vmem:[#allocation2 + $0xf8] sm:$0xff]  ;;  %v350_v3 = vld [vmem:[#allocation2 + $0xf0] sm:$0xff]  ;;  %v349_v4 = vld [vmem:[#allocation2 + $0xe8] sm:$0xff]  ;;  %v496_v62 = vlaneseq }
  0x42   : > { %1220 = vsyncadd (%p1556_p2), [#allocation6], 4294965120  ;;  %416 = vmatprep.mubr.f32.mxu0 %v1248_v0  ;;  %1061 = vset.pattern.permute.xlu0 %v1249_v1  ;;  %v348_v5 = vld [vmem:[#allocation2 + $0xe0] sm:$0xff]  ;;  %v347_v6 = vld [vmem:[#allocation2 + $0xd8] sm:$0xff]  ;;  %vm1250_vm4 = vmmov 0   ;;  %s301_s18 = sand.u32 1, %s1231_s22  }
  0x43   : > { %1062 = vset.pattern.permute.xlu1 %v1249_v1  ;;  %940 = vmatprep.subr.mxu1 %v1248_v0  ;;  %p305_p10 = scmp.lt.s32.totalorder %s304_s9, 5  ;;  %v346_v7 = vld [vmem:[#allocation2 + $0xd0] sm:$0xff]  ;;  %v345_v8 = vld [vmem:[#allocation2 + $0xc8] sm:$0xff]  ;;  %v344_v9 = vld [vmem:[#allocation2 + $0xc0] sm:$0xff]  ;;  %s920_s10 = smul.u32 384, %s1310_s25 }
  0x44   : > { %352 = vmatprep.subr.mxu0 %v351_v2  ;;  %v343_v10 = vld [vmem:[#allocation2 + $0xb8] sm:$0xff]  ;;  %v342_v11 = vld [vmem:[#allocation2 + $0xb0] sm:$0xff]  ;;  %v341_v12 = vld [vmem:[#allocation2 + $0xa8] sm:$0xff]  ;;  %972 = vmatprep.mubr.msk.f32.mxu1 %vm1250_vm4, %v1248_v0  ;;  %s1501_s16 = scalar_lea.sflag [#allocation4], %s301_s18  ;;  %s1251_s25 = smov [#allocation8]  }
  0x45   : > { %353 = vmatpush1.msra.mxu0 %v350_v3  ;;  %s1563_s9 = smov (!%p305_p10, %s304_s9), 5  ;;  %v340_v13 = vld [vmem:[#allocation2 + $0xa0] sm:$0xff]  ;;  %v339_v14 = vld [vmem:[#allocation2 + $0x98] sm:$0xff]  ;;  %v338_v15 = vld [vmem:[#allocation2 + $0x90] sm:$0xff]  ;;  %s1499_s15 = scalar_lea.hbm %s1547_s6, %s920_s10 }
  0x46   : > { %354 = vmatprep.subr.mxu0 %v349_v4  ;;  %s898_s12 = sshll.u32 %s1563_s9, 3  ;;  %v337_v17 = vld [vmem:[#allocation2 + $0x88] sm:$0xff]  ;;  %v336_v19 = vld [vmem:[#allocation2 + $0x80] sm:$0xff]  ;;  %v335_v21 = vld [vmem:[#allocation2 + $0x78] sm:$0xff]  ;;  %s1175_s9 = sshll.u32 %s1251_s25, 4  ;;  %s1176_s9 = int_to_ptr.vmem [resolvable:$false] %s1175_s9 }
  0x47   : > { %355 = vmatpush1.msra.mxu0 %v348_v5  ;;  %s314_s19 = scalar_lea.vmem %s1542_s1, %s898_s12  ;;  %v334_v22 = vld [vmem:[#allocation2 + $0x70] sm:$0xff]  ;;  %v333_v23 = vld [vmem:[#allocation2 + $0x68] sm:$0xff]  ;;  %v332_v24 = vld [vmem:[#allocation2 + $0x60] sm:$0xff]  ;;  %s308_s28 = scalar_lea.vmem %s1541_s0, %s898_s12 }
  0x48   : > { %356 = vmatprep.subr.mxu0 %v347_v6  ;;  %v472_v16 = vld [vmem:[%s314_s19] sm:$0xff]  ;;  %v473_v18 = vld [vmem:[%s314_s19 + $0x8] sm:$0xff]  ;;  %v474_v20 = vld [vmem:[%s314_s19 + $0x10] sm:$0xff]  ;;  %v497_v6 = vshrl.u32 %v496_v62, 7  ;;  %s981_s19 = smul.u32 24, %s301_s18  ;;  %s1177_s12 = scalar_lea.vmem %s1176_s9, 768 }
  0x49   : > { %357 = vmatpush1.msra.mxu0 %v346_v7  ;;  %477 = vperm.xlu0 %1061, %v472_v16   ;;  %v331_v25 = vld [vmem:[#allocation2 + $0x58] sm:$0xff]  ;;  %v330_v26 = vld [vmem:[#allocation2 + $0x50] sm:$0xff]  ;;  %v329_v27 = vld [vmem:[#allocation2 + $0x48] sm:$0xff] }
  0x4a   : > { %358 = vmatprep.subr.mxu0 %v345_v8  ;;  %482 = vperm.xlu1 %1062, %v473_v18   ;;  %v328_v28 = vld [vmem:[#allocation2 + $0x40] sm:$0xff]  ;;  %v327_v29 = vld [vmem:[#allocation2 + $0x38] sm:$0xff]  ;;  %v326_v30 = vld [vmem:[#allocation2 + $0x30] sm:$0xff]  ;;  %vm498_vm0 = vcmp.lt.s32.totalorder %v497_v6, 2  ;;  %vm516_vm1 = vcmp.lt.s32.totalorder %v497_v6, 1  ;;  %vm545_vm2 = vcmp.lt.s32.totalorder %v497_v6, 7 }
  0x4b   : > { %359 = vmatpush1.msra.mxu0 %v344_v9  ;;  %v325_v31 = vld [vmem:[#allocation2 + $0x28] sm:$0xff]  ;;  %v324_v32 = vld [vmem:[#allocation2 + $0x20] sm:$0xff]  ;;  %v323_v33 = vld [vmem:[#allocation2 + $0x18] sm:$0xff]  ;;  %vm563_vm3 = vcmp.lt.s32.totalorder %v497_v6, 6 }
  0x4c   : > { %360 = vmatprep.subr.mxu0 %v343_v10  ;;  %v322_v34 = vld [vmem:[#allocation2 + $0x10] sm:$0xff]  ;;  %v321_v35 = vld [vmem:[#allocation2 + $0x8] sm:$0xff]  ;;  %v320_v36 = vld [vmem:[#allocation2] sm:$0xff] }
  0x4d   : > { %361 = vmatpush1.msra.mxu0 %v342_v11  ;;  %487 = vperm.xlu0 %1061, %v474_v20   ;;  %v317_v37 = vld [vmem:[%s308_s28] sm:$0xff]  ;;  %v318_v38 = vld [vmem:[%s308_s28 + $0x8] sm:$0xff]  ;;  %v319_v39 = vld [vmem:[%s308_s28 + $0x10] sm:$0xff]  ;;  %s303_s28 = scalar_lea.vmem [#allocation8], %s981_s19 }
  0x4e   : > { %362 = vmatprep.subr.mxu0 %v341_v12  ;;  %v901_v41 = vld [vmem:[%s1545_s4 + $0x1] ss:$0 sm:$0xff]  ;;  %v900_v59 = vld [vmem:[%s1545_s4] ss:$0 sm:$0xff]  ;;  %s783_s29 = sshll.u32 %s303_s28, 4  ;;  %s1494_s29 = int_to_ptr.vmem [resolvable:$true] %s783_s29 }
  0x4f   : > { %363 = vmatpush1.msra.mxu0 %v340_v13  ;;  %v905_v12 = vld [vmem:[#allocation7] ss:$0 sm:$0xff]  ;;  %s1171_s17 = scalar_lea.vmem %s1494_s29, 384  ;;  %p1178_p6 = scmp.lt.s32.totalorder %s1494_s29, %s1176_s9 }
  0x50   : > { %364 = vmatprep.subr.mxu0 %v339_v14  ;;  %p1172_p12 = scmp.ne.s32.totalorder %s1494_s29, %s1171_s17  ;;  %p1179_p9 = scmp.lt.s32.totalorder %s1177_s12, %s1171_s17 }
  0x51   : > { %365 = vmatpush1.msra.mxu0 %v338_v15 }
  0x52   : > { %366 = vmatprep.subr.mxu0 %v337_v17  ;;  %v906_v17 = vld [vmem:[#allocation7 + $0x1] ss:$0 sm:$0xff]  ;;  %p1173_p4 = pnand %p1172_p12, %p1327_p5  ;;  %p1180_p8 = por %p1179_p9, %p1178_p6 }
  0x53   : > { %367 = vmatpush1.msra.mxu0 %v336_v19 }
  0x54   : > { %368 = vmatprep.subr.mxu0 %v335_v21  ;;  %p1174_p7 = pneg %p1173_p4 }
  0x55   : > { %369 = vmatpush1.msra.mxu0 %v334_v22 }
  0x56   : > { %370 = vmatprep.subr.mxu0 %v333_v23  ;;  %p1181_p11 = pnand %p1180_p8, %p1174_p7 }
  0x57   : > { %371 = vmatpush1.msra.mxu0 %v332_v24 }
  0x58   : > { %372 = vmatprep.subr.mxu0 %v331_v25 }
  0x59   : > { %373 = vmatpush1.msra.mxu0 %v330_v26 }
  0x5a   : > { %374 = vmatprep.subr.mxu0 %v329_v27 }
  0x5b   : > { %375 = vmatpush1.msra.mxu0 %v328_v28  ;;  %v907_v28 = vld [vmem:[#allocation7 + $0x2] ss:$0 sm:$0xff] }
  0x5c   : > { %376 = vmatprep.subr.mxu0 %v327_v29 }
  0x5d   : > { %377 = vmatpush1.msra.mxu0 %v326_v30 }
  0x5e   : > { %378 = vmatprep.subr.mxu0 %v325_v31 }
  0x5f   : > { %379 = vmatpush1.msra.mxu0 %v324_v32 }
  0x60   : > { %380 = vmatprep.subr.mxu0 %v323_v33 }
  0x61   : > { %381 = vmatpush1.msra.mxu0 %v322_v34 }
  0x62   : > { %382 = vmatprep.subr.mxu0 %v321_v35  ;;  %v908_v35 = vld [vmem:[#allocation7 + $0x3] ss:$0 sm:$0xff] }
  0x63   : > { %383 = vmatpush1.msra.mxu0 %v320_v36 }
  0x64   : > { %417 = vmatmul.mubr.f32.vlgmr.msra.gmra.mxu0 %v317_v37 }
  0x65   : > { %422 = vmatprep.mubr.f32.mxu0 %v1248_v0 }
  0x68   : > { %423 = vmatmul.mubr.f32.gmra.mxu0 %v318_v38 }
  0x69   : > { %428 = vmatprep.mubr.f32.mxu0 %v1248_v0 }
  0x6c   : > { %429 = vmatmul.mubr.f32.gmra.mxu0 %v319_v39 }
  0xc4   : > { %v478_v63 = vpop.permute.xlu0 %477 }
  0xc5   : > { %v483_v5 = vpop.permute.xlu1 %482 }
  0xc8   : > { %v488_v18 = vpop.permute.xlu0 %487 }
 0x124   : > { %v418_v40 = vpop.f32.mrf.mxu0 }
 0x125   : > { %v440_v60 = vadd.f32 %v900_v59, %v418_v40 }
 0x126   : > { %v420_v42 = vpop.f32.mrf.mxu0 }
 0x127   : > { %v448_v43 = vadd.f32 %v901_v41, %v420_v42 }
 0x128   : > { %v424_v44 = vpop.f32.mrf.mxu0 }
 0x129   : > { %v902_v45 = vmul.f32 -1.442695, %v448_v43  ;;  %v441_v2 = vadd.f32 %v900_v59, %v424_v44  ;;  %v909_v43 = vld [vmem:[#allocation7 + $0x4] ss:$0 sm:$0xff] }
 0x12a   : > { %v426_v46 = vpop.f32.mrf.mxu0 }
 0x12b   : > { %1063 = vpow2.f32 %v902_v45  ;;  %v449_v47 = vadd.f32 %v901_v41, %v426_v46 }
 0x12c   : > { %v430_v48 = vpop.f32.mrf.mxu0 }
 0x12d   : > { %v903_v49 = vmul.f32 -1.442695, %v449_v47  ;;  %v442_v8 = vadd.f32 %v900_v59, %v430_v48 }
 0x12e   : > { %v432_v50 = vpop.f32.mrf.mxu0 }
 0x12f   : > { %1065 = vpow2.f32 %v903_v49  ;;  %v450_v51 = vadd.f32 %v901_v41, %v432_v50 }
 0x131   : > { %v904_v52 = vmul.f32 -1.442695, %v450_v51 }
 0x133   : > { %1067 = vpow2.f32 %v904_v52  ;;  %v910_v52 = vld [vmem:[%s1545_s4 + $0x2] ss:$0 sm:$0xff] }
 0x138   : > { %v1064_v53 = vpop.eup %1063 }
 0x139   : > { %v460_v54 = vadd.f32 1.0, %v1064_v53 }
 0x13b   : > { %1069 = vrcp.f32 %v460_v54 }
 0x13c   : > { %v1066_v55 = vpop.eup %1065 }
 0x13d   : > { %v461_v56 = vadd.f32 1.0, %v1066_v55 }
 0x13f   : > { %1071 = vrcp.f32 %v461_v56 }
 0x140   : > { %v1068_v57 = vpop.eup %1067 }
 0x141   : > { %v462_v58 = vadd.f32 1.0, %v1068_v57 }
 0x143   : > { %1073 = vrcp.f32 %v462_v58 }
 0x148   : > { %v1070_v61 = vpop.eup %1069 }
 0x149   : > { %v469_v1 = vmul.f32 %v1070_v61, %v440_v60 }
 0x14b   : > { %v1410_v4 = vmul.f32 %v478_v63, %v469_v1 }
 0x14c   : > { %v1072_v3 = vpop.eup %1071 }
 0x14d   : > { %v470_v7 = vmul.f32 %v1072_v3, %v441_v2  ;;  %v493_v11 = vrot.slane %v1410_v4, 6  ;;  %v513_v13 = vrot.slane %v1410_v4, 7  ;;  %v542_v33 = vrot.slane %v1410_v4, 1 }
 0x14e   : > { %v560_v42 = vrot.slane %v1410_v4, 2  ;;  %v536_v54 = vmul.f32 %v907_v28, %v1410_v4 }
 0x14f   : > { %v491_v9 = vmul.f32 %v483_v5, %v470_v7 }
 0x150   : > { %v1074_v10 = vpop.eup %1073 }
 0x151   : > { %v494_v14 = vrot.slane %v491_v9, 6  ;;  %v514_v15 = vrot.slane %v491_v9, 7  ;;  %v471_v16 = vmul.f32 %v1074_v10, %v442_v8  ;;  %v543_v24 = vrot.slane %v491_v9, 1 }
 0x152   : > { %v561_v25 = vrot.slane %v491_v9, 2  ;;  %v537_v32 = vmul.f32 %v907_v28, %v491_v9 }
 0x153   : > { %v492_v19 = vmul.f32 %v488_v18, %v471_v16  ;;  %v500_v20 = vsel %vm498_vm0, %v493_v11, %v494_v14  ;;  %v518_v21 = vsel %vm516_vm1, %v513_v13, %v514_v15  ;;  %v547_v45 = vsel %vm545_vm2, %v542_v33, %v543_v24 }
 0x154   : > { %v508_v22 = vmul.f32 %v905_v12, %v500_v20  ;;  %v526_v23 = vmul.f32 %v906_v17, %v518_v21  ;;  %v565_v57 = vsel %vm563_vm3, %v560_v42, %v561_v25  ;;  %v554_v61 = vmul.f32 %v908_v35, %v547_v45 }
 0x155   : > { %v495_v26 = vrot.slane %v492_v19, 6  ;;  %v515_v27 = vrot.slane %v492_v19, 7  ;;  %v544_v29 = vrot.slane %v492_v19, 1  ;;  %v562_v30 = vrot.slane %v492_v19, 2 }
 0x156   : > { %v529_v31 = vadd.f32 %v526_v23, %v508_v22  ;;  %v538_v59 = vmul.f32 %v907_v28, %v492_v19  ;;  %v572_v5 = vmul.f32 %v909_v43, %v565_v57  ;;  %v680_v23 = vld [vmem:[#allocation5 + $0x78] sm:$0xff]  ;;  %v675_v28 = vld [vmem:[#allocation5 + $0x50] sm:$0xff] }
 0x157   : > { %v546_v34 = vsel %vm545_vm2, %v543_v24, %v544_v29  ;;  %v564_v36 = vsel %vm563_vm3, %v561_v25, %v562_v30  ;;  %v501_v37 = vsel %vm498_vm0, %v495_v26, %v493_v11  ;;  %v519_v38 = vsel %vm516_vm1, %v515_v27, %v513_v13  ;;  %v679_v24 = vld [vmem:[#allocation5 + $0x70] sm:$0xff]  ;;  %941 = vmatpush3.msra.mxu1 %v680_v23  ;;  %v678_v25 = vld [vmem:[#allocation5 + $0x68] sm:$0xff]  ;;  %v916_v23 = vld [vmem:[%s1545_s4 + $0x5] ss:$0 sm:$0xff] }
 0x158   : > { %v540_v39 = vadd.f32 %v537_v32, %v529_v31  ;;  %v555_v40 = vmul.f32 %v908_v35, %v546_v34  ;;  %v507_v41 = vmul.f32 %v905_v12, %v501_v37  ;;  %v525_v44 = vmul.f32 %v906_v17, %v519_v38  ;;  %942 = vmatprep.subr.mxu1 %v1248_v0  ;;  %v672_v31 = vld [vmem:[#allocation5 + $0x38] sm:$0xff]  ;;  %v671_v32 = vld [vmem:[#allocation5 + $0x30] sm:$0xff]  ;;  %v669_v34 = vld [vmem:[#allocation5 + $0x20] sm:$0xff] }
 0x159   : > { %v499_v46 = vsel %vm498_vm0, %v494_v14, %v495_v26  ;;  %v517_v47 = vsel %vm516_vm1, %v514_v15, %v515_v27  ;;  %v573_v49 = vmul.f32 %v909_v43, %v564_v36  ;;  %v548_v55 = vsel %vm545_vm2, %v544_v29, %v542_v33  ;;  %943 = vmatpush3.msra.mxu1 %v679_v24  ;;  %v677_v26 = vld [vmem:[#allocation5 + $0x60] sm:$0xff]  ;;  %v676_v27 = vld [vmem:[#allocation5 + $0x58] sm:$0xff]  ;;  %v674_v29 = vld [vmem:[#allocation5 + $0x48] sm:$0xff] }
 0x15a   : > { %v558_v48 = vadd.f32 %v555_v40, %v540_v39  ;;  %v509_v50 = vmul.f32 %v905_v12, %v499_v46  ;;  %v527_v51 = vmul.f32 %v906_v17, %v517_v47  ;;  %v528_v53 = vadd.f32 %v525_v44, %v507_v41  ;;  %944 = vmatprep.subr.mxu1 %v1248_v0  ;;  %v670_v33 = vld [vmem:[#allocation5 + $0x28] sm:$0xff]  ;;  %v667_v36 = vld [vmem:[#allocation5 + $0x10] sm:$0xff]  ;;  %v665_v38 = vld [vmem:[#allocation5] sm:$0xff] }
 0x15b   : > { %v566_v62 = vsel %vm563_vm3, %v562_v30, %v560_v42  ;;  %v556_v2 = vmul.f32 %v908_v35, %v548_v55  ;;  %945 = vmatpush3.msra.mxu1 %v678_v25  ;;  %v673_v30 = vld [vmem:[#allocation5 + $0x40] sm:$0xff]  ;;  %v668_v35 = vld [vmem:[#allocation5 + $0x18] sm:$0xff]  ;;  %v666_v37 = vld [vmem:[#allocation5 + $0x8] sm:$0xff] }
 0x15c   : > { %v576_v56 = vadd.f32 %v573_v49, %v558_v48  ;;  %v530_v58 = vadd.f32 %v527_v51, %v509_v50  ;;  %v539_v60 = vadd.f32 %v536_v54, %v528_v53  ;;  %v574_v8 = vmul.f32 %v909_v43, %v566_v62  ;;  %946 = vmatprep.subr.mxu1 %v1248_v0 }
 0x15d   : > { %947 = vmatpush3.msra.mxu1 %v677_v26 }
 0x15e   : > { %v584_v63 = vadd.f32 %v910_v52, %v576_v56  ;;  %v541_v1 = vadd.f32 %v538_v59, %v530_v58  ;;  %v557_v3 = vadd.f32 %v554_v61, %v539_v60  ;;  %948 = vmatprep.subr.mxu1 %v1248_v0  ;;  %v911_v58 = vld [vmem:[%s1545_s4 + $0x3] ss:$0 sm:$0xff]  ;;  %v912_v60 = vld [vmem:[%s1545_s4 + $0x4] ss:$0 sm:$0xff] }
 0x15f   : > { %949 = vmatpush3.msra.mxu1 %v676_v27 }
 0x160   : > { %588 = vadd.xlane.f32.xlu0 %v584_v63  ;;  %v559_v7 = vadd.f32 %v556_v2, %v541_v1  ;;  %v575_v4 = vadd.f32 %v572_v5, %v557_v3  ;;  %950 = vmatprep.subr.mxu1 %v1248_v0 }
 0x161   : > { %951 = vmatpush3.msra.mxu1 %v675_v28 }
 0x162   : > { %v577_v9 = vadd.f32 %v574_v8, %v559_v7  ;;  %v583_v10 = vadd.f32 %v910_v52, %v575_v4  ;;  %952 = vmatprep.subr.mxu1 %v1248_v0 }
 0x163   : > { %953 = vmatpush3.msra.mxu1 %v674_v29 }
 0x164   : > { %v585_v11 = vadd.f32 %v910_v52, %v577_v9  ;;  %586 = vadd.xlane.f32.xlu1 %v583_v10  ;;  %954 = vmatprep.subr.mxu1 %v1248_v0 }
 0x165   : > { %955 = vmatpush3.msra.mxu1 %v673_v30 }
 0x166   : > { %590 = vadd.xlane.f32.xlu0 %v585_v11  ;;  %956 = vmatprep.subr.mxu1 %v1248_v0 }
 0x167   : > { %957 = vmatpush3.msra.mxu1 %v672_v31 }
 0x168   : > { %958 = vmatprep.subr.mxu1 %v1248_v0 }
 0x169   : > { %959 = vmatpush3.msra.mxu1 %v671_v32 }
 0x16a   : > { %960 = vmatprep.subr.mxu1 %v1248_v0 }
 0x16b   : > { %961 = vmatpush3.msra.mxu1 %v670_v33 }
 0x16c   : > { %962 = vmatprep.subr.mxu1 %v1248_v0 }
 0x16d   : > { %963 = vmatpush3.msra.mxu1 %v669_v34 }
 0x16e   : > { %964 = vmatprep.subr.mxu1 %v1248_v0 }
 0x16f   : > { %965 = vmatpush3.msra.mxu1 %v668_v35 }
 0x170   : > { %966 = vmatprep.subr.mxu1 %v1248_v0 }
 0x171   : > { %967 = vmatpush3.msra.mxu1 %v667_v36 }
 0x172   : > { %968 = vmatprep.subr.mxu1 %v1248_v0 }
 0x173   : > { %969 = vmatpush3.msra.mxu1 %v666_v37 }
 0x174   : > { %970 = vmatprep.subr.mxu1 %v1248_v0 }
 0x175   : > { %971 = vmatpush3.msra.mxu1 %v665_v38 }
 0x1e9   : > { %v589_v12 = vpop.xlane.xlu0 %588 }
 0x1ea   : > { %v1432_v13 = vmul.f32 0.015625, %v589_v12 }
 0x1ec   : > { %v1435_v6 = vsub.f32 %v584_v63, %v1432_v13  ;;  %v608_v39 = vmul.f32 64.0, %v1432_v13 }
 0x1ed   : > { %v587_v14 = vpop.xlane.xlu1 %586 }
 0x1ee   : > { %v599_v15 = vmul.f32 %v1435_v6, %v1435_v6  ;;  %v1439_v16 = vmul.f32 0.015625, %v587_v14  ;;  %v611_v40 = vmul.f32 %v608_v39, %v1432_v13 }
 0x1ef   : > { %v591_v17 = vpop.xlane.xlu0 %590 }
 0x1f0   : > { %v1441_v18 = vmul.f32 0.015625, %v591_v17  ;;  %603 = vadd.xlane.f32.xlu0 %v599_v15  ;;  %v1444_v19 = vsub.f32 %v583_v10, %v1439_v16  ;;  %v607_v42 = vmul.f32 64.0, %v1439_v16 }
 0x1f2   : > { %v598_v20 = vmul.f32 %v1444_v19, %v1444_v19  ;;  %v1449_v21 = vsub.f32 %v585_v11, %v1441_v18  ;;  %v610_v45 = vmul.f32 %v607_v42, %v1439_v16  ;;  %v609_v46 = vmul.f32 64.0, %v1441_v18 }
 0x1f4   : > { %601 = vadd.xlane.f32.xlu1 %v598_v20  ;;  %v600_v22 = vmul.f32 %v1449_v21, %v1449_v21  ;;  %v612_v51 = vmul.f32 %v609_v46, %v1441_v18 }
 0x1f8   : > { %605 = vadd.xlane.f32.xlu1 %v600_v22 }
 0x279   : > { %v604_v41 = vpop.xlane.xlu0 %603 }
 0x27a   : > { %v614_v43 = vsub.f32 %v604_v41, %v611_v40 }
 0x27c   : > { %v617_v44 = vmul.f32 0.015625, %v614_v43 }
 0x27d   : > { %v602_v48 = vpop.xlane.xlu1 %601 }
 0x27e   : > { %v620_v47 = vadd.f32 1e-05, %v617_v44  ;;  %v613_v49 = vsub.f32 %v602_v48, %v610_v45 }
 0x280   : > { %1075 = vrsqrt.f32 %v620_v47  ;;  %v616_v50 = vmul.f32 0.015625, %v613_v49 }
 0x281   : > { %v606_v52 = vpop.xlane.xlu1 %605 }
 0x282   : > { %v619_v53 = vadd.f32 1e-05, %v616_v50  ;;  %v615_v54 = vsub.f32 %v606_v52, %v612_v51 }
 0x284   : > { %1077 = vrsqrt.f32 %v619_v53  ;;  %v618_v55 = vmul.f32 0.015625, %v615_v54 }
 0x286   : > { %v621_v56 = vadd.f32 1e-05, %v618_v55 }
 0x288   : > { %1079 = vrsqrt.f32 %v621_v56 }
 0x28d   : > { %v1076_v57 = vpop.eup %1075 }
 0x28e   : > { %v626_v59 = vmul.f32 %v1076_v57, %v1435_v6 }
 0x290   : > { %v634_v61 = vmul.f32 %v911_v58, %v626_v59 }
 0x291   : > { %v1078_v62 = vpop.eup %1077 }
 0x292   : > { %v642_v63 = vadd.f32 %v912_v60, %v634_v61  ;;  %v625_v1 = vmul.f32 %v1078_v62, %v1444_v19 }
 0x294   : > { %v633_v2 = vmul.f32 %v911_v58, %v625_v1  ;;  %v914_v3 = vmul.f32 -1.442695, %v642_v63 }
 0x295   : > { %v1080_v5 = vpop.eup %1079 }
 0x296   : > { %v641_v7 = vadd.f32 %v912_v60, %v633_v2  ;;  %v627_v8 = vmul.f32 %v1080_v5, %v1449_v21  ;;  %1081 = vpow2.f32 %v914_v3 }
 0x298   : > { %v913_v4 = vmul.f32 -1.442695, %v641_v7  ;;  %v635_v9 = vmul.f32 %v911_v58, %v627_v8 }
 0x29a   : > { %1083 = vpow2.f32 %v913_v4  ;;  %v643_v10 = vadd.f32 %v912_v60, %v635_v9 }
 0x29c   : > { %v915_v11 = vmul.f32 -1.442695, %v643_v10 }
 0x29e   : > { %1085 = vpow2.f32 %v915_v11 }
 0x2a3   : > { %v1082_v12 = vpop.eup %1081 }
 0x2a4   : > { %v654_v14 = vadd.f32 1.0, %v1082_v12 }
 0x2a7   : > { %v1084_v13 = vpop.eup %1083 }
 0x2a8   : > { %v653_v6 = vadd.f32 1.0, %v1084_v13 }
 0x2aa   : > { %1087 = vrcp.f32 %v653_v6 }
 0x2ab   : > { %v1086_v15 = vpop.eup %1085  ;;  %1089 = vrcp.f32 %v654_v14 }
 0x2ac   : > { %v655_v16 = vadd.f32 1.0, %v1086_v15 }
 0x2ae   : > { %1091 = vrcp.f32 %v655_v16 }
 0x2b7   : > { %v1088_v17 = vpop.eup %1087 }
 0x2b8   : > { %v662_v18 = vmul.f32 %v1088_v17, %v641_v7  ;;  %v1090_v19 = vpop.eup %1089 }
 0x2b9   : > { %v663_v20 = vmul.f32 %v1090_v19, %v642_v63 }
 0x2ba   : > { %973 = vmatmul.mubr.f32.vlgmr.msra.gmra.mxu1 %v662_v18 }
 0x2bb   : > { %975 = vmatprep.mubr.msk.f32.mxu1 %vm1250_vm4, %v1248_v0  ;;  %v1092_v21 = vpop.eup %1091 }
 0x2bc   : > { %v664_v22 = vmul.f32 %v1092_v21, %v643_v10 }
 0x2be   : > { %976 = vmatmul.mubr.f32.gmra.mxu1 %v663_v20 }
 0x2bf   : > { %978 = vmatprep.mubr.msk.f32.mxu1 %vm1250_vm4, %v1248_v0 }
 0x2c2   : > { %979 = vmatmul.mubr.f32.gmra.mxu1 %v664_v22 }
 0x37a   : > { %v752_v24 = vpop.f32.mrf.mxu1 }
 0x37b   : > { %v753_v25 = vadd.f32 %v916_v23, %v752_v24 }
 0x37c   : > { %v974_v26 = vpop.f32.mrf.mxu1 }
 0x37d   : > { %766 = vst [vmem:[%s303_s28] sm:$0xff] %v753_v25 }
 0x37e   : > { %v757_v27 = vpop.f32.mrf.mxu1 }
 0x37f   : > { %v758_v28 = vadd.f32 %v916_v23, %v757_v27 }
 0x380   : > { %v977_v29 = vpop.f32.mrf.mxu1 }
 0x381   : > { %767 = vst [vmem:[%s303_s28 + $0x8] sm:$0xff] %v758_v28 }
 0x382   : > { %v762_v0 = vpop.f32.mrf.mxu1 }
 0x383   : > { %v763_v30 = vadd.f32 %v916_v23, %v762_v0 }
 0x384   : > { %v980_v31 = vpop.f32.mrf.mxu1 }
 0x385   : > { %768 = vst [vmem:[%s303_s28 + $0x10] sm:$0xff] %v763_v30 }
 0x386   : > { %1184 = shalt.err (!%p1181_p11)
}
 0x387   : > { %s1185_s14 = scalar_lea.hbm %s1499_s15, 384  ;;  %s1189_s20 = scalar_lea.hbm %s1547_s6, 768 }
 0x388   : > { %p1186_p0 = scmp.ne.s32.totalorder %s1499_s15, %s1185_s14  ;;  %p1190_p3 = scmp.lt.s32.totalorder %s1499_s15, %s1547_s6 }
 0x389   : > { %p1191_p2 = scmp.lt.s32.totalorder %s1189_s20, %s1185_s14 }
 0x38a   : > { %p1187_p1 = pnand %p1186_p0, %p1327_p5 }
 0x38b   : > { %p1192_p10 = por %p1191_p2, %p1190_p3 }
 0x38c   : > { %p1188_p13 = pneg %p1187_p1 }
 0x38e   : > { %p1193_p12 = pnand %p1192_p10, %p1188_p13 }
 0x390   : > { %1196 = shalt.err (!%p1193_p12)
}
 0x391   : > { %s1252_s10 = smov 128   ;;  %s1253_s11 = smov 8  }
 0x392   : > { %994 = dma.vmem_to_hbm [thread:$0]  (%p1327_p5), %s1494_s29, 384, %s1499_s15, %s1501_s16, %s1252_s10, %s1252_s10, %s1253_s11  }
 0x393 PF: > { %p1016_p4 = scmp.ge.s32.totalorder %s1239_s24, 2  ;;  %s798_s13 = sand.u32 1, %s1227_s21  }
 0x394   : > { %p1557_p7 = scmp.ne.s32.totalorder %s1550_s8, 0  ;;  %s799_s17 = scalar_lea.sflag [#allocation4], %s798_s13 }
 0x396   : > { %p1007_p6 = pnand %p1016_p4, %p1557_p7 }
 0x398   : > { %p1008_p9 = pneg %p1007_p6 }
 0x39a   : > { %1222 = dma.done.wait (%p1008_p9), %s799_s17, 384  }
 0x39b   : > { %1224 = vsyncadd (%p1008_p9), %s799_s17, 4294966912  ;;  %p18_p8 = scmp.ge.s32.totalorder %s1314_s27, 4   ;;  %s1558_s21 = smov %s1231_s22 }
 0x39c   : > { %s1559_s22 = smov %s1235_s23  ;;  %s1560_s23 = smov %s1325_s30 }
 0x39d   : > { %s1561_s24 = smov %s1314_s27  ;;  %20 = sbr.rel (!%p18_p8) target bundleno = 5 (0x5), region = 95 }
 0x3a2   :  { %804 = vsyncpa [#allocation3], 1 }
 0x3a3   :  { %806 = vsyncpa [#allocation3 + $0x1], 1 }
 0x3a4   :  { %807 = vsyncpa [#allocation6], 1 }
 0x3a5   :  { %808 = vsyncpa [#allocation4], 1 }
 0x3a6   :  { %810 = vsyncpa [#allocation4 + $0x1], 1 }

</bundles_post_ra>
